<compile_context>
chip_gen: v5e
topology: v5e:2x2
jax: 0.10.0
libtpu: 0.0.40
codegen_flags: <defaults>
</compile_context>

<pallas_src>
import jax
import jax.numpy as jnp
from jax.experimental import pallas as pl
from jax.experimental.pallas import tpu as pltpu

TEXTURE_LOSS_WEIGHT = 2.0
OFFSET = 8                      # 2 ** 3 (constant in the reference loop)
NUM_TEXTURE_TERMS = 3           # range(3) adds the identical term 3 times
TEXT_SCALE = float(TEXTURE_LOSS_WEIGHT * NUM_TEXTURE_TERMS)   # 6.0, plain Python float


# ---------------------------------------------------------------------------
# Kernels
# ---------------------------------------------------------------------------
def _texture_loss_kernel_roll(yp_ref, yt_ref, out_ref):
    """Fused kernel: XLU rotate for the lane-axis (dx) shift, one big reduction."""
    c_blk, H, W = yp_ref.shape
    d = yp_ref[...].astype(jnp.float32) - yt_ref[...].astype(jnp.float32)

    # dx only mixes values along W, so collapse (c, H) -> rows (free when H % 8 == 0).
    dflat = d.reshape(c_blk * H, W)

    # Rotate by -OFFSET (mod W) along lanes; positive amount avoids any
    # negative-shift validation.  Exactly OFFSET lanes hold wrapped values; no
    # matter which end of the row they land on, the wrapped pairs are always
    # columns (j, W-OFFSET+j), j in [0, OFFSET) -> subtract that contribution
    # explicitly, which makes the result independent of the rotate direction.
    rolled = pltpu.roll(dflat, W - OFFSET, 1)
    dxf = dflat - rolled                                   # W-OFFSET valid + OFFSET wrapped lanes
    wrap = dflat[:, :OFFSET] - dflat[:, W - OFFSET:]       # (rows, OFFSET): wrapped-pair deltas

    # dy: 8-row shift along the sublane axis is tile-aligned -> plain slices are cheap.
    dy = d[:, :-OFFSET, :] - d[:, OFFSET:, :]

    # One fused elementwise pass over the full slab, then a single big reduction
    # plus one (H-8)-row reduction and one tiny correction reduction.
    acc = dflat * dflat + TEXT_SCALE * (dxf * dxf)
    partial = (jnp.sum(acc)
               - TEXT_SCALE * jnp.sum(wrap * wrap)
               + TEXT_SCALE * jnp.sum(dy * dy))

    # One independent, lane-dense (1, 8, 128) partial per grid step (no
    # cross-step dependency -> the grid axis is megacore-"parallel").
    out_ref[...] = jnp.full(out_ref.shape, partial, dtype=jnp.float32)


def _texture_loss_kernel_slice(yp_ref, yt_ref, out_ref):
    """Numerically identical fallback using plain slices (always lowers / interprets)."""
    d = yp_ref[...].astype(jnp.float32) - yt_ref[...].astype(jnp.float32)
    dx = d[:, :, :-OFFSET] - d[:, :, OFFSET:]
    dy = d[:, :-OFFSET, :] - d[:, OFFSET:, :]
    partial = jnp.sum(d * d) + TEXT_SCALE * (jnp.sum(dx * dx) + jnp.sum(dy * dy))
    out_ref[...] = jnp.full(out_ref.shape, partial, dtype=jnp.float32)


# ---------------------------------------------------------------------------
# Wrapper
# ---------------------------------------------------------------------------
def _vmem_limit_bytes():
    """Generation-aware scoped-VMEM limit: ~3/4 of physical VMEM.

    v5e/v6e have 128 MiB VMEM -> ~96 MiB; v7x has 64 MiB per TC -> ~48 MiB.
    Falls back to the conservative 48 MiB if the query is unavailable.
    """
    try:
        cap = int(pltpu.get_tpu_info().vmem_capacity_bytes)
    except Exception:
        cap = 64 * 1024 * 1024
    return max(16 * 1024 * 1024, (cap * 3) // 4)


def _texture_loss_impl(y_pred, y_true, *, use_roll):
    N, C, H, W = y_pred.shape
    total = N * C

    vmem_limit = _vmem_limit_bytes()
    # Per-step budget: 2 inputs x 2 pipeline buffers + ~4x-block fused f32
    # temporaries -> keep the f32 block at roughly 1/10 of the scoped limit.
    max_block_elems = max(H * W, vmem_limit // (10 * 4))
    max_chans = max(1, max_block_elems // (H * W))
    if total >= 2:
        # Keep at least 2 grid steps so the "parallel" axis can shard across
        # TensorCores on multi-TC parts (v7x) and the pipeline has >1 stage.
        max_chans = min(max_chans, pl.cdiv(total, 2))
    c_blk = max(1, min(max_chans, total))
    grid = pl.cdiv(total, c_blk)

    yp = y_pred.reshape(total, H, W)
    yt = y_true.reshape(total, H, W)
    pad = grid * c_blk - total
    if pad:
        # Zero slabs contribute exactly 0 to every partial sum.
        yp = jnp.concatenate([yp, jnp.zeros((pad, H, W), yp.dtype)], axis=0)
        yt = jnp.concatenate([yt, jnp.zeros((pad, H, W), yt.dtype)], axis=0)

    elems = grid * c_blk * H * W
    in_bytes = 2 * elems * y_pred.dtype.itemsize
    cost = pl.CostEstimate(
        flops=9 * elems,                            # ~9 VPU ops / element
        transcendentals=0,
        bytes_accessed=in_bytes + grid * 8 * 128 * 4,
    )

    kernel = _texture_loss_kernel_roll if use_roll else _texture_loss_kernel_slice
    partials = pl.pallas_call(
        kernel,
        out_shape=jax.ShapeDtypeStruct((grid, 8, 128), jnp.float32),
        grid=(grid,),
        in_specs=[
            pl.BlockSpec((c_blk, H, W), lambda i: (i, 0, 0)),
            pl.BlockSpec((c_blk, H, W), lambda i: (i, 0, 0)),
        ],
        out_specs=pl.BlockSpec((1, 8, 128), lambda i: (i, 0, 0)),
        compiler_params=pltpu.CompilerParams(
            # NOTE: on v7x consider pltpu.CORE_PARALLEL here to force 2-TC sharding.
            dimension_semantics=("parallel",),
            vmem_limit_bytes=int(vmem_limit),
        ),
        cost_estimate=cost,
    )(yp, yt)

    # Every element of each (8, 128) block equals that step's partial -> dense
    # contiguous reduce; divide out the 8*128 replication and the batch mean.
    return jnp.sum(partials) / jnp.float32(N * 8 * 128)


def texture_loss(y_pred, y_true):
    assert y_pred.shape == y_true.shape and y_pred.ndim == 4
    N, C, H, W = y_pred.shape
    assert H > OFFSET and W > OFFSET, "spatial dims must exceed the texture offset (8)"
    try:
        out = _texture_loss_impl(y_pred, y_true, use_roll=True)
        return jax.block_until_ready(out)
    except Exception:
        # pltpu.roll unavailable in this execution config -> identical math via slices.
        return _texture_loss_impl(y_pred, y_true, use_roll=False)


# ---------------------------------------------------------------------------
# Pure-JAX reference (mirrors the PyTorch module line-by-line)
# ---------------------------------------------------------------------------
def texture_loss_ref(y_pred, y_true):
    def l2(a, b):
        n = a.shape[0]
        diffsq = (a - b) ** 2
        return jnp.mean(jnp.sum(diffsq.reshape(n, -1), axis=1))

    loss = l2(y_pred, y_true)
    text_loss = 0.0
    for _ in range(3):
        dist = 2 ** 3
        text_loss += l2(y_pred[:, :, :, :-dist] - y_pred[:, :, :, dist:],
                        y_true[:, :, :, :-dist] - y_true[:, :, :, dist:])
        text_loss += l2(y_pred[:, :, :-dist, :] - y_pred[:, :, dist:, :],
                        y_true[:, :, :-dist, :] - y_true[:, :, dist:, :])
    return loss + TEXTURE_LOSS_WEIGHT * text_loss


if __name__ == "__main__":
    key = jax.random.PRNGKey(0)
    k1, k2 = jax.random.split(key)
    N, C, H, W = 2, 4, 16, 16
    y_pred = jax.random.normal(k1, (N, C, H, W), dtype=jnp.float32)
    y_true = jax.random.normal(k2, (N, C, H, W), dtype=jnp.float32)

    out = texture_loss(y_pred, y_true)
    out = jax.block_until_ready(out)

    ref = texture_loss_ref(y_pred, y_true)
    assert jnp.allclose(out, ref, rtol=1e-5, atol=1e-4), (out, ref)

    print("KERNEL_OK")
</pallas_src>

<mosaic_0001>
module attributes {stable_mosaic.version = 11 : i64} {
  func.func @_texture_loss_kernel_roll(%arg0: i32, %arg1: memref<4x16x16xf32, #tpu.memory_space<vmem>>, %arg2: memref<4x16x16xf32, #tpu.memory_space<vmem>>, %arg3: memref<1x8x128xf32, #tpu.memory_space<vmem>>) attributes {dimension_semantics = [#tpu.dimension_semantics<parallel>], iteration_bounds = array<i64: 2>, scalar_prefetch = 0 : i64, scratch_operands = 0 : i64, tpu.core_type = #tpu.core_type<tc>, window_params = [{transform_indices = @transform_0, window_bounds = array<i64: 4, 16, 16>}, {transform_indices = @transform_1, window_bounds = array<i64: 4, 16, 16>}, {transform_indices = @transform_2, window_bounds = array<i64: 1, 8, 128>}]} {
    %c0 = arith.constant 0 : index
    %c0_0 = arith.constant 0 : index
    %c0_1 = arith.constant 0 : index
    %0 = vector.load %arg1[%c0, %c0_0, %c0_1] : memref<4x16x16xf32, #tpu.memory_space<vmem>>, vector<4x16x16xf32>
    %c0_2 = arith.constant 0 : index
    %c0_3 = arith.constant 0 : index
    %c0_4 = arith.constant 0 : index
    %1 = vector.load %arg2[%c0_2, %c0_3, %c0_4] : memref<4x16x16xf32, #tpu.memory_space<vmem>>, vector<4x16x16xf32>
    %2 = arith.subf %0, %1 : vector<4x16x16xf32>
    %3 = vector.shape_cast %2 : vector<4x16x16xf32> to vector<64x16xf32>
    %c8_i32 = arith.constant 8 : i32
    %4 = tpu.dynamic_rotate %3 by %c8_i32 dim 1 : vector<64x16xf32>, i32 -> vector<64x16xf32>
    %5 = arith.subf %3, %4 : vector<64x16xf32>
    %6 = vector.extract_strided_slice %3 {offsets = [0, 0], sizes = [64, 8], strides = [1, 1]} : vector<64x16xf32> to vector<64x8xf32>
    %7 = vector.extract_strided_slice %3 {offsets = [0, 8], sizes = [64, 8], strides = [1, 1]} : vector<64x16xf32> to vector<64x8xf32>
    %8 = arith.subf %6, %7 : vector<64x8xf32>
    %9 = vector.extract_strided_slice %2 {offsets = [0, 0, 0], sizes = [4, 8, 16], strides = [1, 1, 1]} : vector<4x16x16xf32> to vector<4x8x16xf32>
    %10 = vector.extract_strided_slice %2 {offsets = [0, 8, 0], sizes = [4, 8, 16], strides = [1, 1, 1]} : vector<4x16x16xf32> to vector<4x8x16xf32>
    %11 = arith.subf %9, %10 : vector<4x8x16xf32>
    %12 = arith.mulf %3, %3 : vector<64x16xf32>
    %13 = arith.mulf %5, %5 : vector<64x16xf32>
    %cst = arith.constant 6.000000e+00 : f32
    %14 = vector.broadcast %cst : f32 to vector<64x16xf32>
    %15 = arith.mulf %14, %13 : vector<64x16xf32>
    %16 = arith.addf %12, %15 : vector<64x16xf32>
    %17 = vector.shape_cast %16 : vector<64x16xf32> to vector<1x64x16xf32>
    %cst_5 = arith.constant dense<0.000000e+00> : vector<1xf32>
    %18 = vector.multi_reduction <add>, %17, %cst_5 [1, 2] : vector<1x64x16xf32> to vector<1xf32>
    %19 = vector.shape_cast %18 : vector<1xf32> to vector<1x1x1xf32>
    %20 = vector.extract %19[0, 0, 0] : f32 from vector<1x1x1xf32>
    %21 = arith.mulf %8, %8 : vector<64x8xf32>
    %22 = vector.shape_cast %21 : vector<64x8xf32> to vector<1x64x8xf32>
    %cst_6 = arith.constant dense<0.000000e+00> : vector<1xf32>
    %23 = vector.multi_reduction <add>, %22, %cst_6 [1, 2] : vector<1x64x8xf32> to vector<1xf32>
    %24 = vector.shape_cast %23 : vector<1xf32> to vector<1x1x1xf32>
    %25 = vector.extract %24[0, 0, 0] : f32 from vector<1x1x1xf32>
    %cst_7 = arith.constant 6.000000e+00 : f32
    %26 = arith.mulf %cst_7, %25 : f32
    %27 = arith.subf %20, %26 : f32
    %28 = arith.mulf %11, %11 : vector<4x8x16xf32>
    %29 = vector.shape_cast %28 : vector<4x8x16xf32> to vector<1x4x8x16xf32>
    %cst_8 = arith.constant dense<0.000000e+00> : vector<1xf32>
    %30 = vector.multi_reduction <add>, %29, %cst_8 [1, 2, 3] : vector<1x4x8x16xf32> to vector<1xf32>
    %31 = vector.shape_cast %30 : vector<1xf32> to vector<1x1x1x1xf32>
    %32 = vector.extract %31[0, 0, 0, 0] : f32 from vector<1x1x1x1xf32>
    %cst_9 = arith.constant 6.000000e+00 : f32
    %33 = arith.mulf %cst_9, %32 : f32
    %34 = arith.addf %27, %33 : f32
    %35 = vector.broadcast %34 : f32 to vector<1x8x128xf32>
    %c0_10 = arith.constant 0 : index
    %c0_11 = arith.constant 0 : index
    %c0_12 = arith.constant 0 : index
    %36 = vector.load %arg3[%c0_10, %c0_11, %c0_12] : memref<1x8x128xf32, #tpu.memory_space<vmem>>, vector<1x8x128xf32>
    tpu.vector_store %arg3[%c0_10, %c0_11, %c0_12], %35 {strides = array<i32>} : memref<1x8x128xf32, #tpu.memory_space<vmem>>, vector<1x8x128xf32>,
    return
  }
  func.func @transform_0(%arg0: i32) -> (i32, i32, i32) {
    %c0_i32 = arith.constant 0 : i32
    %c0_i32_0 = arith.constant 0 : i32
    %c0_i32_1 = arith.constant 0 : i32
    return %arg0, %c0_i32, %c0_i32_0 : i32, i32, i32
  }
  func.func @transform_1(%arg0: i32) -> (i32, i32, i32) {
    %c0_i32 = arith.constant 0 : i32
    %c0_i32_0 = arith.constant 0 : i32
    %c0_i32_1 = arith.constant 0 : i32
    return %arg0, %c0_i32, %c0_i32_0 : i32, i32, i32
  }
  func.func @transform_2(%arg0: i32) -> (i32, i32, i32) {
    %c0_i32 = arith.constant 0 : i32
    %c0_i32_0 = arith.constant 0 : i32
    %c0_i32_1 = arith.constant 0 : i32
    return %arg0, %c0_i32, %c0_i32_0 : i32, i32, i32
  }
}

module attributes {stable_mosaic.version = 11 : i64} {
  func.func @_texture_loss_kernel_slice(%arg0: i32, %arg1: memref<4x16x16xf32, #tpu.memory_space<vmem>>, %arg2: memref<4x16x16xf32, #tpu.memory_space<vmem>>, %arg3: memref<1x8x128xf32, #tpu.memory_space<vmem>>) attributes {dimension_semantics = [#tpu.dimension_semantics<parallel>], iteration_bounds = array<i64: 2>, scalar_prefetch = 0 : i64, scratch_operands = 0 : i64, tpu.core_type = #tpu.core_type<tc>, window_params = [{transform_indices = @transform_0, window_bounds = array<i64: 4, 16, 16>}, {transform_indices = @transform_1, window_bounds = array<i64: 4, 16, 16>}, {transform_indices = @transform_2, window_bounds = array<i64: 1, 8, 128>}]} {
    %c0 = arith.constant 0 : index
    %c0_0 = arith.constant 0 : index
    %c0_1 = arith.constant 0 : index
    %0 = vector.load %arg1[%c0, %c0_0, %c0_1] : memref<4x16x16xf32, #tpu.memory_space<vmem>>, vector<4x16x16xf32>
    %c0_2 = arith.constant 0 : index
    %c0_3 = arith.constant 0 : index
    %c0_4 = arith.constant 0 : index
    %1 = vector.load %arg2[%c0_2, %c0_3, %c0_4] : memref<4x16x16xf32, #tpu.memory_space<vmem>>, vector<4x16x16xf32>
    %2 = arith.subf %0, %1 : vector<4x16x16xf32>
    %3 = vector.extract_strided_slice %2 {offsets = [0, 0, 0], sizes = [4, 16, 8], strides = [1, 1, 1]} : vector<4x16x16xf32> to vector<4x16x8xf32>
    %4 = vector.extract_strided_slice %2 {offsets = [0, 0, 8], sizes = [4, 16, 8], strides = [1, 1, 1]} : vector<4x16x16xf32> to vector<4x16x8xf32>
    %5 = arith.subf %3, %4 : vector<4x16x8xf32>
    %6 = vector.extract_strided_slice %2 {offsets = [0, 0, 0], sizes = [4, 8, 16], strides = [1, 1, 1]} : vector<4x16x16xf32> to vector<4x8x16xf32>
    %7 = vector.extract_strided_slice %2 {offsets = [0, 8, 0], sizes = [4, 8, 16], strides = [1, 1, 1]} : vector<4x16x16xf32> to vector<4x8x16xf32>
    %8 = arith.subf %6, %7 : vector<4x8x16xf32>
    %9 = arith.mulf %2, %2 : vector<4x16x16xf32>
    %10 = vector.shape_cast %9 : vector<4x16x16xf32> to vector<1x4x16x16xf32>
    %cst = arith.constant dense<0.000000e+00> : vector<1xf32>
    %11 = vector.multi_reduction <add>, %10, %cst [1, 2, 3] : vector<1x4x16x16xf32> to vector<1xf32>
    %12 = vector.shape_cast %11 : vector<1xf32> to vector<1x1x1x1xf32>
    %13 = vector.extract %12[0, 0, 0, 0] : f32 from vector<1x1x1x1xf32>
    %14 = arith.mulf %5, %5 : vector<4x16x8xf32>
    %15 = vector.shape_cast %14 : vector<4x16x8xf32> to vector<1x4x16x8xf32>
    %cst_5 = arith.constant dense<0.000000e+00> : vector<1xf32>
    %16 = vector.multi_reduction <add>, %15, %cst_5 [1, 2, 3] : vector<1x4x16x8xf32> to vector<1xf32>
    %17 = vector.shape_cast %16 : vector<1xf32> to vector<1x1x1x1xf32>
    %18 = vector.extract %17[0, 0, 0, 0] : f32 from vector<1x1x1x1xf32>
    %19 = arith.mulf %8, %8 : vector<4x8x16xf32>
    %20 = vector.shape_cast %19 : vector<4x8x16xf32> to vector<1x4x8x16xf32>
    %cst_6 = arith.constant dense<0.000000e+00> : vector<1xf32>
    %21 = vector.multi_reduction <add>, %20, %cst_6 [1, 2, 3] : vector<1x4x8x16xf32> to vector<1xf32>
    %22 = vector.shape_cast %21 : vector<1xf32> to vector<1x1x1x1xf32>
    %23 = vector.extract %22[0, 0, 0, 0] : f32 from vector<1x1x1x1xf32>
    %24 = arith.addf %18, %23 : f32
    %cst_7 = arith.constant 6.000000e+00 : f32
    %25 = arith.mulf %cst_7, %24 : f32
    %26 = arith.addf %13, %25 : f32
    %27 = vector.broadcast %26 : f32 to vector<1x8x128xf32>
    %c0_8 = arith.constant 0 : index
    %c0_9 = arith.constant 0 : index
    %c0_10 = arith.constant 0 : index
    %28 = vector.load %arg3[%c0_8, %c0_9, %c0_10] : memref<1x8x128xf32, #tpu.memory_space<vmem>>, vector<1x8x128xf32>
    tpu.vector_store %arg3[%c0_8, %c0_9, %c0_10], %27 {strides = array<i32>} : memref<1x8x128xf32, #tpu.memory_space<vmem>>, vector<1x8x128xf32>,
    return
  }
  func.func @transform_0(%arg0: i32) -> (i32, i32, i32) {
    %c0_i32 = arith.constant 0 : i32
    %c0_i32_0 = arith.constant 0 : i32
    %c0_i32_1 = arith.constant 0 : i32
    return %arg0, %c0_i32, %c0_i32_0 : i32, i32, i32
  }
  func.func @transform_1(%arg0: i32) -> (i32, i32, i32) {
    %c0_i32 = arith.constant 0 : i32
    %c0_i32_0 = arith.constant 0 : i32
    %c0_i32_1 = arith.constant 0 : i32
    return %arg0, %c0_i32, %c0_i32_0 : i32, i32, i32
  }
  func.func @transform_2(%arg0: i32) -> (i32, i32, i32) {
    %c0_i32 = arith.constant 0 : i32
    %c0_i32_0 = arith.constant 0 : i32
    %c0_i32_1 = arith.constant 0 : i32
    return %arg0, %c0_i32, %c0_i32_0 : i32, i32, i32
  }
}

</mosaic_0001>

<bundles_post_ra>
// kernel: tpu_custom_call.1
= control target key start
LH: loop header
LB: loop body
LE: loop exit
PB: predicated region body
PF: predicated region fallthrough
CT: control target
= control target key end

     0   :  { %7 = vsyncpa [#allocation3], 0  ;;  %s1175_s0 = inlined_call_operand.hbm [shape: f32[8,16,16], index: 0, kind: input, shape index: {}]   ;;  %s1176_s1 = inlined_call_operand.hbm [shape: f32[8,16,16], index: 1, kind: input, shape index: {}]   ;;  %s1177_s2 = inlined_call_operand.hbm [shape: f32[2,8,128], index: 2, kind: output, shape index: {}]  }
   0x1   :  { %9 = vsyncpa [#allocation3 + $0x1], 0 }
   0x2   :  { %10 = vsyncpa [#allocation6], 0 }
   0x3   :  { %12 = vsyncpa [#allocation6 + $0x1], 0 }
   0x4   :  { %13 = vsyncpa [#allocation4], 0 }
   0x5   :  { %15 = vsyncpa [#allocation4 + $0x1], 0  ;;  %s827_s9 = smov 0   ;;  %s829_s10 = smov 0  }
   0x6   :  { %s831_s11 = smov 0   ;;  %s833_s12 = smov 0  }
   0x7 LB: > { %s848_s13 = sadd.s32 4294967295, %s806_s12   ;;  %s592_s14 = sadd.s32 4294967294, %s806_s12   ;;  %s806_s12 = sphi %s833_s12, %s1188_s12   ;;  %s802_s11 = sphi %s831_s11, %s1187_s11   ;;  %s798_s10 = sphi %s829_s10, %s1186_s10   ;;  %s794_s9 = sphi %s827_s9, %s1185_s9  }
   0x8   : > { %s852_s15 = sadd.s32 1, %s806_s12   ;;  %s28_s16 = sadd.s32 1, %s802_s11 }
   0x9   : > { %s25_s17 = ssub.s32 %s806_s12, %s852_s15  ;;  %p35_p0 = scmp.ne.s32.totalorder %s802_s11, %s798_s10 }
   0xa   : > { %p26_p1 = scmp.eq.s32.totalorder %s25_s17, 0  ;;  %p36_p2 = scmp.eq.s32.totalorder %s806_s12, 0 }
   0xb   : > { %p41_p3 = scmp.ne.s32.totalorder %s798_s10, %s794_s9  ;;  %p42_p4 = scmp.eq.s32.totalorder %s848_s13, 0 }
   0xc   : > { %s864_s18 = scalar_select %p26_p1, %s802_s11, %s28_s16  }
   0xd   : > { %p866_p5 = por %p36_p2, %p35_p0  ;;  %p870_p6 = por %p42_p4, %p41_p3 }
   0xe   : > { %p91_p7 = scmp.eq.s32.totalorder %s848_s13, 1  ;;  %p97_p8 = scmp.eq.s32.totalorder %s592_s14, 1 }
   0xf   : > { %p638_p10 = scmp.lt.s32.totalorder %s806_s12, 2  ;;  %s886_s23 = sand.u32 1, %s802_s11  }
  0x10   : > { %p877_p11 = por %p91_p7, %p35_p0  ;;  %p881_p12 = por %p97_p8, %p41_p3 }
  0x11   : > { %s612_s24 = sshll.u32 %s806_s12, 6  ;;  %s595_s25 = sshll.u32 %s886_s23, 6 }
  0x12   : > { %s127_s28 = scalar_lea.hbm %s1175_s0, %s612_s24  ;;  %s121_s30 = scalar_lea.vmem [#allocation2], %s595_s25 }
  0x13   : > { %s128_s29 = sshll.u32 %s127_s28, 4  ;;  %s130_s3 = sshll.u32 %s121_s30, 4  ;;  %s129_s29 = int_to_ptr.hbm [resolvable:$true] %s128_s29  ;;  %s131_s3 = int_to_ptr.vmem [resolvable:$true] %s130_s3 }
  0x14   : > { %p899_p13 = pnand %p638_p10, %p866_p5  ;;  %p603_p0 = scmp.ge.s32.totalorder %s806_s12, 1 }
  0x15   : > { %p161_p1 = scmp.lt.s32.totalorder %s806_s12, 3  ;;  %s118_s5 = scalar_lea.sflag [#allocation3], %s886_s23 }
  0x16   : > { %s676_s6 = sshra.s32 %s129_s29, 4  ;;  %p680_p3 = pneg %p899_p13  ;;  %s677_s6 = int_to_ptr.hbm [resolvable:$true] %s676_s6 }
  0x17   : > { %s678_s7 = scalar_lea.hbm %s677_s6, 64  ;;  %s683_s16 = scalar_lea.hbm %s1175_s0, 128 }
  0x18   : > { %p679_p2 = scmp.ne.s32.totalorder %s677_s6, %s678_s7  ;;  %p684_p5 = scmp.lt.s32.totalorder %s677_s6, %s1175_s0 }
  0x19   : > { %p685_p8 = scmp.lt.s32.totalorder %s683_s16, %s678_s7 }
  0x1a   : > { %p681_p4 = pnand %p680_p3, %p679_p2 }
  0x1b   : > { %p686_p10 = por %p685_p8, %p684_p5 }
  0x1c   : > { %p682_p7 = pneg %p681_p4 }
  0x1e   : > { %p687_p9 = pnand %p686_p10, %p682_p7 }
  0x20   : > { %690 = shalt.err (!%p687_p9)
}
  0x21   : > { %s808_s26 = smov 128   ;;  %s809_s27 = smov 8  }
  0x22   : > { %630 = dma.hbm_to_vmem [thread:$0]  (!%p899_p13), %s129_s29, 1024, %s131_s3, %s118_s5, %s808_s26, %s808_s26, %s809_s27  }
  0x23   : > { %p923_p2 = pnand %p603_p0, %p161_p1  ;;  %s150_s7 = scalar_lea.hbm %s1176_s1, %s612_s24 }
  0x24   : > { %s151_s8 = sshll.u32 %s150_s7, 4  ;;  %s144_s14 = scalar_lea.vmem [#allocation5], %s595_s25  ;;  %s152_s8 = int_to_ptr.hbm [resolvable:$true] %s151_s8 }
  0x25   : > { %s153_s16 = sshll.u32 %s144_s14, 4  ;;  %s141_s17 = scalar_lea.sflag [#allocation6], %s886_s23  ;;  %s154_s16 = int_to_ptr.vmem [resolvable:$true] %s153_s16 }
  0x26   : > { %s706_s19 = sshra.s32 %s152_s8, 4  ;;  %s713_s30 = scalar_lea.hbm %s1176_s1, 128  ;;  %s707_s19 = int_to_ptr.hbm [resolvable:$true] %s706_s19 }
  0x27   : > { %s708_s29 = scalar_lea.hbm %s707_s19, 64  ;;  %p714_p4 = scmp.lt.s32.totalorder %s707_s19, %s1176_s1 }
  0x28   : > { %p709_p9 = scmp.ne.s32.totalorder %s707_s19, %s708_s29  ;;  %p715_p7 = scmp.lt.s32.totalorder %s713_s30, %s708_s29 }
  0x2a   : > { %p711_p0 = pnand %p709_p9, %p680_p3  ;;  %p716_p5 = por %p715_p7, %p714_p4 }
  0x2c   : > { %p712_p1 = pneg %p711_p0 }
  0x2e   : > { %p717_p8 = pnand %p716_p5, %p712_p1 }
  0x30   : > { %720 = shalt.err (!%p717_p8)
}
  0x31   : > { %633 = dma.hbm_to_vmem [thread:$0]  (!%p899_p13), %s152_s8, 1024, %s154_s16, %s141_s17, %s808_s26, %s808_s26, %s809_s27  }
  0x32   : > { %165 = sbr.rel (%p923_p2) target bundleno = 637 (0x27d), region = 28  ;;  %s949_s23 = sand.u32 (!%p923_p2), 1, %s798_s10  }
  0x33   : > { %s604_s25 = sshll.u32 (!%p923_p2), %s949_s23, 6  ;;  %s168_s7 = scalar_lea.sflag (!%p923_p2), [#allocation3], %s949_s23 }
  0x34   : > { %s953_s14 = scalar_lea.vmem (!%p923_p2), [#allocation2], %s604_s25 }
  0x37   : > { %781 = dma.done.wait (%p870_p6), %s168_s7, 1024  }
  0x38   : > { %783 = vsyncadd (%p870_p6), %s168_s7, 4294966272  ;;  %s178_s4 = scalar_lea.sflag [#allocation6], %s949_s23  ;;  %s960_s26 = scalar_lea.vmem [#allocation5], %s604_s25 }
  0x39   : > { %785 = dma.done.wait (%p870_p6), %s178_s4, 1024  }
  0x3a   : > { %787 = vsyncadd (%p870_p6), %s178_s4, 4294966272  ;;  %v212_v0 = vld [vmem:[%s953_s14 + $0x10] sm:$0xff]  ;;  %v210_v2 = vld [vmem:[%s953_s14] sm:$0xff]  ;;  %s810_s20 = smov 16   ;;  %vm234_vm0 = vcmask 1047680   ;;  %s811_s27 = smov 120  }
  0x3b   : > { %v220_v1 = vld [vmem:[%s960_s26 + $0x10] sm:$0xff]  ;;  %v218_v4 = vld [vmem:[%s960_s26] sm:$0xff]  ;;  %v213_v8 = vld [vmem:[%s953_s14 + $0x18] sm:$0xff]  ;;  %vm399_vm1 = vcmask 130048   ;;  %vm432_vm2 = vcmask 64512   ;;  %s606_s28 = sshll.u32 %s949_s23, 3 }
  0x3c   : > { %v969_v3 = vsub.f32 %v212_v0, %v220_v1  ;;  %v972_v5 = vsub.f32 %v210_v2, %v218_v4  ;;  %v214_v6 = vld [vmem:[%s953_s14 + $0x20] sm:$0xff]  ;;  %v221_v9 = vld [vmem:[%s960_s26 + $0x18] sm:$0xff]  ;;  %v211_v11 = vld [vmem:[%s953_s14 + $0x8] sm:$0xff]  ;;  %s608_s8 = sshll.u32 %s848_s13, 3  ;;  %s207_s24 = scalar_lea.vmem [#allocation7], %s606_s28 }
  0x3d   : > { %v222_v7 = vld [vmem:[%s960_s26 + $0x20] sm:$0xff]  ;;  %v219_v12 = vld [vmem:[%s960_s26 + $0x8] sm:$0xff]  ;;  %v988_v13 = vsub.f32 %v213_v8, %v221_v9  ;;  %v217_v18 = vld [vmem:[%s953_s14 + $0x38] sm:$0xff]  ;;  %s494_s29 = scalar_lea.hbm %s1177_s2, %s608_s8  ;;  %s496_s6 = sshll.u32 %s207_s24, 4  ;;  %s497_s6 = int_to_ptr.vmem [resolvable:$true] %s496_s6 }
  0x3e   : > { %241 = vrot.lane.b32.xlu1 %v969_v3, %s810_s20  ;;  %235 = vrot.lane.b32.xlu0 %v972_v5, %s810_s20  ;;  %v982_v10 = vsub.f32 %v214_v6, %v222_v7  ;;  %v215_v14 = vld [vmem:[%s953_s14 + $0x28] sm:$0xff]  ;;  %v992_v16 = vsub.f32 %v211_v11, %v219_v12  ;;  %v225_v19 = vld [vmem:[%s960_s26 + $0x38] sm:$0xff]  ;;  %s498_s25 = sshll.u32 %s494_s29, 4  ;;  %s484_s13 = scalar_lea.sflag [#allocation4], %s949_s23  ;;  %s499_s25 = int_to_ptr.hbm [resolvable:$true] %s498_s25 }
  0x3f   : > { %v223_v15 = vld [vmem:[%s960_s26 + $0x28] sm:$0xff]  ;;  %v216_v20 = vld [vmem:[%s953_s14 + $0x30] sm:$0xff]  ;;  %v1006_v22 = vsub.f32 %v217_v18, %v225_v19  ;;  %v364_v62 = vsub.f32 %v969_v3, %v988_v13  ;;  %s756_s28 = scalar_lea.hbm %s1177_s2, 16 }
  0x40   : > { %247 = vrot.lane.b32.xlu2 %v982_v10, %s810_s20  ;;  %v994_v17 = vsub.f32 %v215_v14, %v223_v15  ;;  %v224_v21 = vld [vmem:[%s960_s26 + $0x30] sm:$0xff]  ;;  %v363_v61 = vsub.f32 %v972_v5, %v992_v16  ;;  %s750_s26 = sshra.s32 %s499_s25, 4  ;;  %s751_s26 = int_to_ptr.hbm [resolvable:$true] %s750_s26 }
  0x41   : > { %v1008_v23 = vsub.f32 %v216_v20, %v224_v21  ;;  %v460_v4 = vmul.f32 %v364_v62, %v364_v62  ;;  %p757_p10 = scmp.lt.s32.totalorder %s751_s26, %s1177_s2 }
  0x42   : > { %v365_v63 = vsub.f32 %v982_v10, %v994_v17  ;;  %v459_v0 = vmul.f32 %v363_v61, %v363_v61 }
  0x43   : > { %v366_v6 = vsub.f32 %v1008_v23, %v1006_v22  ;;  %v464_v9 = vsel %vm399_vm1, %v460_v4, 0.0 }
  0x44   : > { %v461_v7 = vmul.f32 %v365_v63, %v365_v63  ;;  %v463_v8 = vsel %vm399_vm1, %v459_v0, 0.0 }
  0x45   : > { %v462_v14 = vmul.f32 %v366_v6, %v366_v6  ;;  %v465_v15 = vadd.f32 %v464_v9, %v463_v8  ;;  %v373_v6 = vmul.f32 %v1008_v23, %v1008_v23 }
  0x46   : > { %244 = vrot.lane.b32.xlu1 %v988_v13, %s810_s20  ;;  %238 = vrot.lane.b32.xlu0 %v992_v16, %s810_s20  ;;  %v466_v18 = vsel %vm399_vm1, %v461_v7, 0.0 }
  0x47   : > { %v467_v21 = vadd.f32 %v466_v18, %v465_v15 }
  0x48   : > { %250 = vrot.lane.b32.xlu2 %v994_v17, %s810_s20 }
  0x4e   : > { %256 = vrot.lane.b32.xlu1 %v1006_v22, %s810_s20  ;;  %253 = vrot.lane.b32.xlu0 %v1008_v23, %s810_s20 }
  0x9a   : > { %v248_v24 = vpop.permute.xlu2 %247 }
  0x9b   : > { %v249_v36 = vsel %vm234_vm0, %v248_v24, %v982_v10  ;;  %v468_v24 = vsel %vm399_vm1, %v462_v14, 0.0 }
  0xa2   : > { %v251_v29 = vpop.permute.xlu2 %250 }
  0xa3   : > { %v252_v30 = vsel %vm234_vm0, %v251_v29, %v994_v17 }
  0xb0   : > { %v242_v25 = vpop.permute.xlu1 %241  ;;  %v236_v26 = vpop.permute.xlu0 %235 }
  0xb1   : > { %v243_v27 = vsel %vm234_vm0, %v242_v25, %v969_v3  ;;  %v237_v28 = vsel %vm234_vm0, %v236_v26, %v972_v5  ;;  %v469_v26 = vadd.f32 %v468_v24, %v467_v21 }
  0xb2   : > { %263 = vrot.lane.b32.xlu1 %v243_v27, %s810_s20  ;;  %259 = vrot.lane.b32.xlu2 %v237_v28, %s810_s20 }
  0xb8   : > { %v245_v31 = vpop.permute.xlu1 %244  ;;  %v239_v32 = vpop.permute.xlu0 %238 }
  0xb9   : > { %v246_v33 = vsel %vm234_vm0, %v245_v31, %v988_v13  ;;  %v240_v34 = vsel %vm234_vm0, %v239_v32, %v992_v16  ;;  %v368_v31 = vmul.f32 %v992_v16, %v992_v16 }
  0xba   : > { %269 = vrot.lane.b32.xlu1 %v252_v30, %s810_s20  ;;  %261 = vrot.lane.b32.xlu0 %v240_v34, %s810_s20  ;;  %v367_v34 = vmul.f32 %v972_v5, %v972_v5 }
  0xbb   : > { %265 = vrot.lane.b32.xlu2 %v246_v33, %s810_s20 }
  0xc0   : > { %v254_v35 = vpop.permute.xlu0 %253  ;;  %v257_v38 = vpop.permute.xlu1 %256 }
  0xc1   : > { %v255_v37 = vsel %vm234_vm0, %v254_v35, %v1008_v23  ;;  %v258_v39 = vsel %vm234_vm0, %v257_v38, %v1006_v22  ;;  %v369_v38 = vmul.f32 %v969_v3, %v969_v3 }
  0xc2   : > { %337 = vrot.lane.b32.xlu1 %v988_v13, %s811_s27  ;;  %267 = vrot.lane.b32.xlu0 %v249_v36, %s810_s20 }
  0xc3   : > { %271 = vrot.lane.b32.xlu2 %v255_v37, %s810_s20 }
  0xca   : > { %273 = vrot.lane.b32.xlu0 %v258_v39, %s810_s20  ;;  %s752_s20 = scalar_lea.hbm %s751_s26, 8 }
  0xcb   : > { %331 = vrot.lane.b32.xlu2 %v972_v5, %s811_s27  ;;  %p753_p6 = scmp.ne.s32.totalorder %s751_s26, %s752_s20  ;;  %p758_p2 = scmp.lt.s32.totalorder %s756_s28, %s752_s20 }
  0xcd   : > { %p754_p13 = pnand %p753_p6, %p877_p11  ;;  %p759_p9 = por %p758_p2, %p757_p10 }
  0xcf   : > { %p755_p3 = pneg %p754_p13 }
  0xd1   : > { %p760_p0 = pnand %p759_p9, %p755_p3 }
  0xd2   : > { %333 = vrot.lane.b32.xlu0 %v992_v16, %s811_s27 }
  0xd3   : > { %335 = vrot.lane.b32.xlu2 %v969_v3, %s811_s27 }
  0xda   : > { %339 = vrot.lane.b32.xlu0 %v982_v10, %s811_s27 }
 0x10c   : > { %v260_v40 = vpop.permute.xlu2 %259 }
 0x10d   : > { %v275_v41 = vsel %vm234_vm0, %v260_v40, %v972_v5 }
 0x10e   : > { %291 = vrot.lane.b32.xlu1 %v275_v41, %s811_s27 }
 0x115   : > { %v266_v42 = vpop.permute.xlu2 %265 }
 0x116   : > { %v278_v43 = vsel %vm234_vm0, %v266_v42, %v988_v13 }
 0x117   : > { %297 = vrot.lane.b32.xlu1 %v278_v43, %s811_s27 }
 0x11d   : > { %v272_v50 = vpop.permute.xlu2 %271 }
 0x11e   : > { %v281_v51 = vsel %vm234_vm0, %v272_v50, %v1008_v23 }
 0x124   : > { %v264_v44 = vpop.permute.xlu1 %263 }
 0x125   : > { %v277_v45 = vsel %vm234_vm0, %v264_v44, %v969_v3  ;;  %v332_v56 = vpop.permute.xlu2 %331 }
 0x126   : > { %295 = vrot.lane.b32.xlu0 %v277_v45, %s811_s27  ;;  %v355_v30 = vsub.f32 %v972_v5, %v332_v56  ;;  %v372_v56 = vmul.f32 %v994_v17, %v994_v17 }
 0x128   : > { %v424_v42 = vmul.f32 %v355_v30, %v355_v30 }
 0x12a   : > { %v433_v50 = vsel %vm432_vm2, %v424_v42, 0.0 }
 0x12c   : > { %v270_v46 = vpop.permute.xlu1 %269  ;;  %v262_v47 = vpop.permute.xlu0 %261 }
 0x12d   : > { %v280_v48 = vsel %vm234_vm0, %v270_v46, %v994_v17  ;;  %v276_v49 = vsel %vm234_vm0, %v262_v47, %v992_v16  ;;  %v336_v59 = vpop.permute.xlu2 %335 }
 0x12e   : > { %301 = vrot.lane.b32.xlu0 %v280_v48, %s811_s27  ;;  %293 = vrot.lane.b32.xlu2 %v276_v49, %s811_s27  ;;  %v357_v45 = vsub.f32 %v969_v3, %v336_v59 }
 0x134   : > { %v268_v52 = vpop.permute.xlu0 %267  ;;  %v338_v58 = vpop.permute.xlu1 %337 }
 0x135   : > { %v279_v53 = vsel %vm234_vm0, %v268_v52, %v982_v10  ;;  %v358_v49 = vsub.f32 %v988_v13, %v338_v58  ;;  %v370_v52 = vmul.f32 %v988_v13, %v988_v13 }
 0x136   : > { %343 = vrot.lane.b32.xlu0 %v1008_v23, %s811_s27  ;;  %303 = vrot.lane.b32.xlu2 %v281_v51, %s811_s27 }
 0x137   : > { %299 = vrot.lane.b32.xlu1 %v279_v53, %s811_s27  ;;  %v427_v63 = vmul.f32 %v358_v49, %v358_v49 }
 0x13c   : > { %v274_v54 = vpop.permute.xlu0 %273 }
 0x13d   : > { %v282_v55 = vsel %vm234_vm0, %v274_v54, %v1006_v22  ;;  %v426_v54 = vmul.f32 %v357_v45, %v357_v45 }
 0x13e   : > { %341 = vrot.lane.b32.xlu2 %v994_v17, %s811_s27 }
 0x13f   : > { %305 = vrot.lane.b32.xlu1 %v282_v55, %s811_s27 }
 0x144   : > { %v334_v57 = vpop.permute.xlu0 %333 }
 0x145   : > { %v356_v35 = vsub.f32 %v992_v16, %v334_v57 }
 0x147   : > { %345 = vrot.lane.b32.xlu1 %v1006_v22, %s811_s27  ;;  %v425_v46 = vmul.f32 %v356_v35, %v356_v35 }
 0x149   : > { %v434_v55 = vsel %vm432_vm2, %v425_v46, 0.0 }
 0x14c   : > { %v1078_v60 = vpop.permute.xlu0 %339 }
 0x14d   : > { %v359_v8 = vsub.f32 %v982_v10, %v1078_v60 }
 0x171   : > { %470 = vadd.xlane.f32.xlu1 %v469_v26 }
 0x180   : > { %v292_v1 = vpop.permute.xlu1 %291 }
 0x181   : > { %v315_v19 = vsub.f32 %v972_v5, %v292_v1  ;;  %v435_v1 = vadd.f32 %v434_v55, %v433_v50 }
 0x183   : > { %v375_v28 = vmul.f32 %v315_v19, %v315_v19  ;;  %v438_v19 = vsel %vm432_vm2, %v427_v63, 0.0 }
 0x185   : > { %v383_v37 = vmul.f32 6.0, %v375_v28 }
 0x187   : > { %v391_v47 = vadd.f32 %v383_v37, %v367_v34  ;;  %v374_v34 = vmul.f32 %v1006_v22, %v1006_v22 }
 0x188   : > { %v294_v2 = vpop.permute.xlu2 %293 }
 0x189   : > { %v316_v11 = vsub.f32 %v992_v16, %v294_v2  ;;  %v298_v27 = vpop.permute.xlu1 %297  ;;  %v400_v59 = vsel %vm399_vm1, %v391_v47, 0.0  ;;  %v371_v2 = vmul.f32 %v982_v10, %v982_v10 }
 0x18a   : > { %v318_v33 = vsub.f32 %v988_v13, %v298_v27  ;;  %v428_v27 = vmul.f32 %v359_v8, %v359_v8 }
 0x18b   : > { %v376_v25 = vmul.f32 %v316_v11, %v316_v11 }
 0x18c   : > { %v378_v44 = vmul.f32 %v318_v33, %v318_v33  ;;  %v440_v37 = vsel %vm432_vm2, %v428_v27, 0.0 }
 0x18d   : > { %v384_v32 = vmul.f32 6.0, %v376_v25 }
 0x18e   : > { %v386_v53 = vmul.f32 6.0, %v378_v44 }
 0x18f   : > { %v392_v43 = vadd.f32 %v384_v32, %v368_v31 }
 0x190   : > { %v304_v41 = vpop.permute.xlu2 %303  ;;  %v394_v13 = vadd.f32 %v386_v53, %v370_v52 }
 0x191   : > { %v321_v5 = vsub.f32 %v1008_v23, %v304_v41  ;;  %v401_v51 = vsel %vm399_vm1, %v392_v43, 0.0 }
 0x192   : > { %v402_v0 = vadd.f32 %v401_v51, %v400_v59 }
 0x198   : > { %v296_v12 = vpop.permute.xlu0 %295  ;;  %v342_v9 = vpop.permute.xlu2 %341 }
 0x199   : > { %v317_v20 = vsub.f32 %v969_v3, %v296_v12  ;;  %v381_v3 = vmul.f32 %v321_v5, %v321_v5  ;;  %v436_v12 = vsel %vm432_vm2, %v426_v54, 0.0  ;;  %v360_v21 = vsub.f32 %v994_v17, %v342_v9 }
 0x19a   : > { %v437_v25 = vadd.f32 %v436_v12, %v435_v1 }
 0x19b   : > { %v377_v29 = vmul.f32 %v317_v20, %v317_v20  ;;  %v389_v7 = vmul.f32 6.0, %v381_v3  ;;  %v405_v20 = vsel %vm399_vm1, %v394_v13, 0.0  ;;  %v429_v33 = vmul.f32 %v360_v21, %v360_v21 }
 0x19c   : > { %v439_v35 = vadd.f32 %v438_v19, %v437_v25 }
 0x19d   : > { %v385_v39 = vmul.f32 6.0, %v377_v29  ;;  %v397_v26 = vadd.f32 %v389_v7, %v373_v6  ;;  %v442_v41 = vsel %vm432_vm2, %v429_v33, 0.0 }
 0x19f   : > { %v393_v16 = vadd.f32 %v385_v39, %v369_v38 }
 0x1a0   : > { %v302_v36 = vpop.permute.xlu0 %301 }
 0x1a1   : > { %v320_v40 = vsub.f32 %v994_v17, %v302_v36  ;;  %v403_v58 = vsel %vm399_vm1, %v393_v16, 0.0 }
 0x1a2   : > { %v404_v11 = vadd.f32 %v403_v58, %v402_v0 }
 0x1a3   : > { %v380_v48 = vmul.f32 %v320_v40, %v320_v40  ;;  %v411_v40 = vsel %vm399_vm1, %v397_v26, 0.0 }
 0x1a4   : > { %v406_v28 = vadd.f32 %v405_v20, %v404_v11 }
 0x1a5   : > { %v388_v61 = vmul.f32 6.0, %v380_v48 }
 0x1a7   : > { %v396_v14 = vadd.f32 %v388_v61, %v372_v56 }
 0x1a8   : > { %v344_v18 = vpop.permute.xlu0 %343 }
 0x1a9   : > { %v300_v57 = vpop.permute.xlu1 %299  ;;  %v361_v30 = vsub.f32 %v1008_v23, %v344_v18  ;;  %v441_v23 = vadd.f32 %v440_v37, %v439_v35 }
 0x1aa   : > { %v319_v62 = vsub.f32 %v982_v10, %v300_v57  ;;  %v409_v10 = vsel %vm399_vm1, %v396_v14, 0.0 }
 0x1ab   : > { %v430_v38 = vmul.f32 %v361_v30, %v361_v30  ;;  %v443_v47 = vadd.f32 %v442_v41, %v441_v23 }
 0x1ac   : > { %v379_v4 = vmul.f32 %v319_v62, %v319_v62 }
 0x1ad   : > { %v444_v45 = vsel %vm432_vm2, %v430_v38, 0.0 }
 0x1ae   : > { %v387_v15 = vmul.f32 6.0, %v379_v4  ;;  %v445_v49 = vadd.f32 %v444_v45, %v443_v47 }
 0x1b0   : > { %v395_v24 = vadd.f32 %v387_v15, %v371_v2 }
 0x1b1   : > { %v306_v29 = vpop.permute.xlu1 %305 }
 0x1b2   : > { %v407_v60 = vsel %vm399_vm1, %v395_v24, 0.0  ;;  %v322_v31 = vsub.f32 %v1006_v22, %v306_v29 }
 0x1b3   : > { %v408_v32 = vadd.f32 %v407_v60, %v406_v28 }
 0x1b4   : > { %v382_v17 = vmul.f32 %v322_v31, %v322_v31 }
 0x1b5   : > { %v410_v36 = vadd.f32 %v409_v10, %v408_v32 }
 0x1b6   : > { %v390_v39 = vmul.f32 6.0, %v382_v17 }
 0x1b7   : > { %v412_v44 = vadd.f32 %v411_v40, %v410_v36 }
 0x1b8   : > { %v398_v42 = vadd.f32 %v390_v39, %v374_v34 }
 0x1b9   : > { %v346_v43 = vpop.permute.xlu1 %345 }
 0x1ba   : > { %v362_v46 = vsub.f32 %v1006_v22, %v346_v43  ;;  %v413_v5 = vsel %vm399_vm1, %v398_v42, 0.0 }
 0x1bb   : > { %v414_v16 = vadd.f32 %v413_v5, %v412_v44 }
 0x1bc   : > { %v431_v48 = vmul.f32 %v362_v46, %v362_v46 }
 0x1bd   : > { %415 = vadd.xlane.f32.xlu2 %v414_v16 }
 0x1be   : > { %v446_v50 = vsel %vm432_vm2, %v431_v48, 0.0 }
 0x1bf   : > { %v447_v51 = vadd.f32 %v446_v50, %v445_v49 }
 0x1c1   : > { %448 = vadd.xlane.f32.xlu0 %v447_v51 }
 0x1e4   : > { %v471_v52 = vpop.xlane.xlu1 %470 }
 0x1e5   : > { %v472_v53 = vrot.slane %v471_v52, 4 }
 0x1e7   : > { %v473_v55 = vadd.f32 %v472_v53, %v471_v52 }
 0x1e9   : > { %v474_v57 = vrot.slane %v473_v55, 2 }
 0x1eb   : > { %v475_v63 = vadd.f32 %v474_v57, %v473_v55 }
 0x1ed   : > { %v476_v4 = vrot.slane %v475_v63, 1 }
 0x1ef   : > { %v477_v8 = vadd.f32 %v476_v4, %v475_v63 }
 0x230   : > { %v416_v54 = vpop.xlane.xlu2 %415 }
 0x231   : > { %v417_v3 = vrot.slane %v416_v54, 4 }
 0x233   : > { %v418_v56 = vadd.f32 %v417_v3, %v416_v54 }
 0x234   : > { %v449_v59 = vpop.xlane.xlu0 %448 }
 0x235   : > { %v419_v22 = vrot.slane %v418_v56, 2  ;;  %v450_v58 = vrot.slane %v449_v59, 4 }
 0x237   : > { %v451_v61 = vadd.f32 %v450_v58, %v449_v59  ;;  %v420_v62 = vadd.f32 %v419_v22, %v418_v56 }
 0x239   : > { %v452_v0 = vrot.slane %v451_v61, 2  ;;  %v421_v1 = vrot.slane %v420_v62, 1 }
 0x23b   : > { %v453_v13 = vadd.f32 %v452_v0, %v451_v61  ;;  %v422_v2 = vadd.f32 %v421_v1, %v420_v62 }
 0x23d   : > { %615 = vpush %v422_v2  ;;  %v454_v6 = vrot.slane %v453_v13, 1 }
 0x23f   : > { %v455_v7 = vadd.f32 %v454_v6, %v453_v13 }
 0x241   : > { %617 = vpush %v455_v7 }
 0x242   : > { %619 = vpush %v477_v8 }
 0x26e   : > { %s616_s16 = spop %615 }
 0x272   : > { %s618_s3 = spop %617 }
 0x273   : > { %s457_s5 = smul.f32 6.0, %s618_s3  ;;  %s620_s30 = spop %619 }
 0x274   : > { %s479_s14 = smul.f32 6.0, %s620_s30 }
 0x275   : > { %s458_s7 = ssub.f32 %s616_s16, %s457_s5 }
 0x277   : > { %s480_s4 = sadd.f32 %s479_s14, %s458_s7 }
 0x279   : > { %v481_v9 = vstv %s480_s4 }
 0x27a   : > { %482 = vst [vmem:[%s207_s24] sm:$0xff] %v481_v9 }
 0x27b   : > { %763 = shalt.err (!%p760_p0)
}
 0x27c   : > { %625 = dma.vmem_to_hbm [thread:$0]  (%p877_p11), %s497_s6, 128, %s499_s25, %s484_s13  }
 0x27d PF: > { %s510_s23 = sand.u32 1, %s794_s9   ;;  %p1184_p1 = scmp.ge.s32.totalorder %s806_s12, 2 }
 0x27e   : > { %s511_s19 = scalar_lea.sflag [#allocation4], %s510_s23 }
 0x27f   : > { %p635_p4 = pnand %p1184_p1, %p881_p12 }
 0x281   : > { %p636_p7 = pneg %p635_p4 }
 0x283   : > { %789 = dma.done.wait (%p636_p7), %s511_s19, 128  }
 0x284   : > { %791 = vsyncadd (%p636_p7), %s511_s19, 4294967168  ;;  %p18_p5 = scmp.ge.s32.totalorder %s852_s15, 4   ;;  %s1185_s9 = smov %s798_s10 }
 0x285   : > { %s1186_s10 = smov %s802_s11  ;;  %s1187_s11 = smov %s864_s18 }
 0x286   : > { %s1188_s12 = smov %s852_s15  ;;  %20 = sbr.rel (!%p18_p5) target bundleno = 7 (0x7), region = 86 }
 0x28b   :  { %517 = vsyncpa [#allocation3], 1 }
 0x28c   :  { %519 = vsyncpa [#allocation3 + $0x1], 1 }
 0x28d   :  { %520 = vsyncpa [#allocation6], 1 }
 0x28e   :  { %522 = vsyncpa [#allocation6 + $0x1], 1 }
 0x28f   :  { %523 = vsyncpa [#allocation4], 1 }
 0x290   :  { %525 = vsyncpa [#allocation4 + $0x1], 1 }

// kernel: tpu_custom_call.1
= control target key start
LH: loop header
LB: loop body
LE: loop exit
PB: predicated region body
PF: predicated region fallthrough
CT: control target
= control target key end

     0   :  { %7 = vsyncpa [#allocation3], 0  ;;  %s976_s0 = inlined_call_operand.hbm [shape: f32[8,16,16], index: 0, kind: input, shape index: {}]   ;;  %s977_s1 = inlined_call_operand.hbm [shape: f32[8,16,16], index: 1, kind: input, shape index: {}]   ;;  %s978_s2 = inlined_call_operand.hbm [shape: f32[2,8,128], index: 2, kind: output, shape index: {}]  }
   0x1   :  { %9 = vsyncpa [#allocation3 + $0x1], 0 }
   0x2   :  { %10 = vsyncpa [#allocation6], 0 }
   0x3   :  { %12 = vsyncpa [#allocation6 + $0x1], 0 }
   0x4   :  { %13 = vsyncpa [#allocation4], 0 }
   0x5   :  { %15 = vsyncpa [#allocation4 + $0x1], 0  ;;  %s711_s9 = smov 0   ;;  %s713_s10 = smov 0  }
   0x6   :  { %s715_s11 = smov 0   ;;  %s717_s12 = smov 0  }
   0x7 LB: > { %s732_s13 = sadd.s32 4294967295, %s691_s12   ;;  %s478_s14 = sadd.s32 4294967294, %s691_s12   ;;  %s691_s12 = sphi %s717_s12, %s989_s12   ;;  %s687_s11 = sphi %s715_s11, %s988_s11   ;;  %s683_s10 = sphi %s713_s10, %s987_s10   ;;  %s679_s9 = sphi %s711_s9, %s986_s9  }
   0x8   : > { %s736_s15 = sadd.s32 1, %s691_s12   ;;  %s28_s16 = sadd.s32 1, %s687_s11 }
   0x9   : > { %s25_s17 = ssub.s32 %s691_s12, %s736_s15  ;;  %p35_p0 = scmp.ne.s32.totalorder %s687_s11, %s683_s10 }
   0xa   : > { %p26_p1 = scmp.eq.s32.totalorder %s25_s17, 0  ;;  %p36_p2 = scmp.eq.s32.totalorder %s691_s12, 0 }
   0xb   : > { %p41_p3 = scmp.ne.s32.totalorder %s683_s10, %s679_s9  ;;  %p42_p4 = scmp.eq.s32.totalorder %s732_s13, 0 }
   0xc   : > { %s748_s18 = scalar_select %p26_p1, %s687_s11, %s28_s16  }
   0xd   : > { %p750_p5 = por %p36_p2, %p35_p0  ;;  %p754_p6 = por %p42_p4, %p41_p3 }
   0xe   : > { %p91_p7 = scmp.eq.s32.totalorder %s732_s13, 1  ;;  %p97_p8 = scmp.eq.s32.totalorder %s478_s14, 1 }
   0xf   : > { %p524_p10 = scmp.lt.s32.totalorder %s691_s12, 2  ;;  %s770_s23 = sand.u32 1, %s687_s11  }
  0x10   : > { %p761_p11 = por %p91_p7, %p35_p0  ;;  %p765_p12 = por %p97_p8, %p41_p3 }
  0x11   : > { %s498_s24 = sshll.u32 %s691_s12, 6  ;;  %s481_s25 = sshll.u32 %s770_s23, 6 }
  0x12   : > { %s127_s28 = scalar_lea.hbm %s976_s0, %s498_s24  ;;  %s121_s30 = scalar_lea.vmem [#allocation2], %s481_s25 }
  0x13   : > { %s128_s29 = sshll.u32 %s127_s28, 4  ;;  %s130_s3 = sshll.u32 %s121_s30, 4  ;;  %s129_s29 = int_to_ptr.hbm [resolvable:$true] %s128_s29  ;;  %s131_s3 = int_to_ptr.vmem [resolvable:$true] %s130_s3 }
  0x14   : > { %p783_p13 = pnand %p524_p10, %p750_p5  ;;  %p489_p0 = scmp.ge.s32.totalorder %s691_s12, 1 }
  0x15   : > { %p161_p1 = scmp.lt.s32.totalorder %s691_s12, 3  ;;  %s118_s5 = scalar_lea.sflag [#allocation3], %s770_s23 }
  0x16   : > { %s561_s6 = sshra.s32 %s129_s29, 4  ;;  %p565_p3 = pneg %p783_p13  ;;  %s562_s6 = int_to_ptr.hbm [resolvable:$true] %s561_s6 }
  0x17   : > { %s563_s7 = scalar_lea.hbm %s562_s6, 64  ;;  %s568_s16 = scalar_lea.hbm %s976_s0, 128 }
  0x18   : > { %p564_p2 = scmp.ne.s32.totalorder %s562_s6, %s563_s7  ;;  %p569_p5 = scmp.lt.s32.totalorder %s562_s6, %s976_s0 }
  0x19   : > { %p570_p8 = scmp.lt.s32.totalorder %s568_s16, %s563_s7 }
  0x1a   : > { %p566_p4 = pnand %p565_p3, %p564_p2 }
  0x1b   : > { %p571_p10 = por %p570_p8, %p569_p5 }
  0x1c   : > { %p567_p7 = pneg %p566_p4 }
  0x1e   : > { %p572_p9 = pnand %p571_p10, %p567_p7 }
  0x20   : > { %575 = shalt.err (!%p572_p9)
}
  0x21   : > { %s693_s26 = smov 128   ;;  %s694_s27 = smov 8  }
  0x22   : > { %516 = dma.hbm_to_vmem [thread:$0]  (!%p783_p13), %s129_s29, 1024, %s131_s3, %s118_s5, %s693_s26, %s693_s26, %s694_s27  }
  0x23   : > { %p807_p2 = pnand %p489_p0, %p161_p1  ;;  %s150_s7 = scalar_lea.hbm %s977_s1, %s498_s24 }
  0x24   : > { %s151_s8 = sshll.u32 %s150_s7, 4  ;;  %s144_s14 = scalar_lea.vmem [#allocation5], %s481_s25  ;;  %s152_s8 = int_to_ptr.hbm [resolvable:$true] %s151_s8 }
  0x25   : > { %s153_s16 = sshll.u32 %s144_s14, 4  ;;  %s141_s17 = scalar_lea.sflag [#allocation6], %s770_s23  ;;  %s154_s16 = int_to_ptr.vmem [resolvable:$true] %s153_s16 }
  0x26   : > { %s591_s19 = sshra.s32 %s152_s8, 4  ;;  %s598_s30 = scalar_lea.hbm %s977_s1, 128  ;;  %s592_s19 = int_to_ptr.hbm [resolvable:$true] %s591_s19 }
  0x27   : > { %s593_s29 = scalar_lea.hbm %s592_s19, 64  ;;  %p599_p4 = scmp.lt.s32.totalorder %s592_s19, %s977_s1 }
  0x28   : > { %p594_p9 = scmp.ne.s32.totalorder %s592_s19, %s593_s29  ;;  %p600_p7 = scmp.lt.s32.totalorder %s598_s30, %s593_s29 }
  0x2a   : > { %p596_p0 = pnand %p594_p9, %p565_p3  ;;  %p601_p5 = por %p600_p7, %p599_p4 }
  0x2c   : > { %p597_p1 = pneg %p596_p0 }
  0x2e   : > { %p602_p8 = pnand %p601_p5, %p597_p1 }
  0x30   : > { %605 = shalt.err (!%p602_p8)
}
  0x31   : > { %519 = dma.hbm_to_vmem [thread:$0]  (!%p783_p13), %s152_s8, 1024, %s154_s16, %s141_s17, %s693_s26, %s693_s26, %s694_s27  }
  0x32   : > { %165 = sbr.rel (%p807_p2) target bundleno = 393 (0x189), region = 28  ;;  %s833_s23 = sand.u32 (!%p807_p2), 1, %s683_s10  }
  0x33   : > { %s490_s25 = sshll.u32 (!%p807_p2), %s833_s23, 6  ;;  %s168_s7 = scalar_lea.sflag (!%p807_p2), [#allocation3], %s833_s23 }
  0x34   : > { %s837_s14 = scalar_lea.vmem (!%p807_p2), [#allocation2], %s490_s25 }
  0x37   : > { %666 = dma.done.wait (%p754_p6), %s168_s7, 1024  }
  0x38   : > { %668 = vsyncadd (%p754_p6), %s168_s7, 4294966272  ;;  %s178_s4 = scalar_lea.sflag [#allocation6], %s833_s23  ;;  %s844_s26 = scalar_lea.vmem [#allocation5], %s490_s25 }
  0x39   : > { %670 = dma.done.wait (%p754_p6), %s178_s4, 1024  }
  0x3a   : > { %672 = vsyncadd (%p754_p6), %s178_s4, 4294966272  ;;  %v210_v0 = vld [vmem:[%s837_s14] sm:$0xff]  ;;  %v212_v2 = vld [vmem:[%s837_s14 + $0x10] sm:$0xff]  ;;  %s695_s20 = smov 120   ;;  %vm286_vm0 = vcmask 130048   ;;  %vm319_vm1 = vcmask 64512  }
  0x3b   : > { %v218_v1 = vld [vmem:[%s844_s26] sm:$0xff]  ;;  %v220_v4 = vld [vmem:[%s844_s26 + $0x10] sm:$0xff]  ;;  %v211_v6 = vld [vmem:[%s837_s14 + $0x8] sm:$0xff]  ;;  %s492_s27 = sshll.u32 %s833_s23, 3  ;;  %s494_s28 = sshll.u32 %s732_s13, 3 }
  0x3c   : > { %v853_v3 = vsub.f32 %v210_v0, %v218_v1  ;;  %v856_v5 = vsub.f32 %v212_v2, %v220_v4  ;;  %v219_v7 = vld [vmem:[%s844_s26 + $0x8] sm:$0xff]  ;;  %v214_v8 = vld [vmem:[%s837_s14 + $0x20] sm:$0xff]  ;;  %v213_v10 = vld [vmem:[%s837_s14 + $0x18] sm:$0xff]  ;;  %s380_s3 = scalar_lea.hbm %s978_s2, %s494_s28  ;;  %s207_s30 = scalar_lea.vmem [#allocation7], %s492_s27 }
  0x3d   : > { %v222_v9 = vld [vmem:[%s844_s26 + $0x20] sm:$0xff]  ;;  %v221_v11 = vld [vmem:[%s844_s26 + $0x18] sm:$0xff]  ;;  %v868_v13 = vsub.f32 %v211_v6, %v219_v7  ;;  %v215_v15 = vld [vmem:[%s837_s14 + $0x28] sm:$0xff]  ;;  %s382_s24 = sshll.u32 %s207_s30, 4  ;;  %s384_s25 = sshll.u32 %s380_s3, 4  ;;  %s383_s24 = int_to_ptr.vmem [resolvable:$true] %s382_s24  ;;  %s385_s25 = int_to_ptr.hbm [resolvable:$true] %s384_s25 }
  0x3e   : > { %242 = vrot.lane.b32.xlu0 %v853_v3, %s695_s20  ;;  %246 = vrot.lane.b32.xlu1 %v856_v5, %s695_s20  ;;  %v866_v12 = vsub.f32 %v214_v8, %v222_v9  ;;  %v871_v14 = vsub.f32 %v213_v10, %v221_v11  ;;  %v223_v16 = vld [vmem:[%s844_s26 + $0x28] sm:$0xff]  ;;  %v216_v18 = vld [vmem:[%s837_s14 + $0x30] sm:$0xff]  ;;  %v278_v24 = vmul.f32 %v853_v3, %v853_v3  ;;  %s635_s13 = sshra.s32 %s385_s25, 4  ;;  %s641_s27 = scalar_lea.hbm %s978_s2, 16  ;;  %s636_s13 = int_to_ptr.hbm [resolvable:$true] %s635_s13 }
  0x3f   : > { %v876_v17 = vsub.f32 %v215_v15, %v223_v16  ;;  %v224_v19 = vld [vmem:[%s844_s26 + $0x30] sm:$0xff]  ;;  %v217_v20 = vld [vmem:[%s837_s14 + $0x38] sm:$0xff]  ;;  %v279_v25 = vmul.f32 %v868_v13, %v868_v13  ;;  %v280_v26 = vmul.f32 %v856_v5, %v856_v5  ;;  %v274_v35 = vsub.f32 %v853_v3, %v868_v13  ;;  %s370_s14 = scalar_lea.sflag [#allocation4], %s833_s23  ;;  %s637_s4 = scalar_lea.hbm %s636_s13, 8 }
  0x40   : > { %250 = vrot.lane.b32.xlu2 %v866_v12, %s695_s20  ;;  %v225_v21 = vld [vmem:[%s844_s26 + $0x38] sm:$0xff]  ;;  %v883_v22 = vsub.f32 %v216_v18, %v224_v19  ;;  %v287_v27 = vsel %vm286_vm0, %v278_v24, 0.0  ;;  %v281_v30 = vmul.f32 %v871_v14, %v871_v14  ;;  %v282_v33 = vmul.f32 %v866_v12, %v866_v12  ;;  %p638_p6 = scmp.ne.s32.totalorder %s636_s13, %s637_s4  ;;  %p642_p10 = scmp.lt.s32.totalorder %s636_s13, %s978_s2 }
  0x41   : > { %v886_v23 = vsub.f32 %v217_v20, %v225_v21  ;;  %v288_v28 = vsel %vm286_vm0, %v279_v25, 0.0  ;;  %v290_v31 = vsel %vm286_vm0, %v280_v26, 0.0  ;;  %v275_v36 = vsub.f32 %v856_v5, %v871_v14  ;;  %p643_p2 = scmp.lt.s32.totalorder %s641_s27, %s637_s4 }
  0x42   : > { %v289_v29 = vadd.f32 %v288_v28, %v287_v27  ;;  %v292_v34 = vsel %vm286_vm0, %v281_v30, 0.0  ;;  %v283_v38 = vmul.f32 %v876_v17, %v876_v17  ;;  %v294_v39 = vsel %vm286_vm0, %v282_v33, 0.0  ;;  %p639_p13 = pnand %p638_p6, %p761_p11 }
  0x43   : > { %v276_v40 = vsub.f32 %v866_v12, %v876_v17  ;;  %v344_v42 = vmul.f32 %v274_v35, %v274_v35  ;;  %v345_v43 = vmul.f32 %v275_v36, %v275_v36  ;;  %v284_v44 = vmul.f32 %v883_v22, %v883_v22  ;;  %p644_p9 = por %p643_p2, %p642_p10 }
  0x44   : > { %v291_v32 = vadd.f32 %v290_v31, %v289_v29  ;;  %v296_v45 = vsel %vm286_vm0, %v283_v38, 0.0  ;;  %v277_v46 = vsub.f32 %v883_v22, %v886_v23  ;;  %v285_v51 = vmul.f32 %v886_v23, %v886_v23  ;;  %p640_p3 = pneg %p639_p13 }
  0x45   : > { %v346_v48 = vmul.f32 %v276_v40, %v276_v40  ;;  %v348_v49 = vsel %vm286_vm0, %v344_v42, 0.0  ;;  %v349_v50 = vsel %vm286_vm0, %v345_v43, 0.0  ;;  %v298_v52 = vsel %vm286_vm0, %v284_v44, 0.0 }
  0x46   : > { %244 = vrot.lane.b32.xlu0 %v868_v13, %s695_s20  ;;  %248 = vrot.lane.b32.xlu1 %v871_v14, %s695_s20  ;;  %v293_v37 = vadd.f32 %v292_v34, %v291_v32  ;;  %v347_v53 = vmul.f32 %v277_v46, %v277_v46  ;;  %v350_v55 = vadd.f32 %v349_v50, %v348_v49  ;;  %v300_v57 = vsel %vm286_vm0, %v285_v51, 0.0  ;;  %p645_p0 = pnand %p644_p9, %p640_p3 }
  0x47   : > { %v351_v56 = vsel %vm286_vm0, %v346_v48, 0.0 }
  0x48   : > { %252 = vrot.lane.b32.xlu2 %v876_v17, %s695_s20  ;;  %v295_v41 = vadd.f32 %v294_v39, %v293_v37  ;;  %v353_v58 = vsel %vm286_vm0, %v347_v53, 0.0  ;;  %v352_v60 = vadd.f32 %v351_v56, %v350_v55 }
  0x4a   : > { %v297_v47 = vadd.f32 %v296_v45, %v295_v41  ;;  %v354_v61 = vadd.f32 %v353_v58, %v352_v60 }
  0x4c   : > { %v299_v54 = vadd.f32 %v298_v52, %v297_v47 }
  0x4e   : > { %254 = vrot.lane.b32.xlu0 %v883_v22, %s695_s20  ;;  %256 = vrot.lane.b32.xlu1 %v886_v23, %s695_s20  ;;  %v301_v59 = vadd.f32 %v300_v57, %v299_v54 }
  0x71   : > { %302 = vadd.xlane.f32.xlu2 %v301_v59 }
  0x78   : > { %355 = vadd.xlane.f32.xlu1 %v354_v61 }
  0x9a   : > { %v251_v62 = vpop.permute.xlu2 %250 }
  0x9b   : > { %v270_v15 = vsub.f32 %v866_v12, %v251_v62 }
  0x9d   : > { %v315_v24 = vmul.f32 %v270_v15, %v270_v15 }
  0x9f   : > { %v327_v29 = vsel %vm319_vm1, %v315_v24, 0.0 }
  0xa2   : > { %v253_v6 = vpop.permute.xlu2 %252 }
  0xa3   : > { %v271_v18 = vsub.f32 %v876_v17, %v253_v6 }
  0xa5   : > { %v316_v25 = vmul.f32 %v271_v18, %v271_v18 }
  0xa7   : > { %v329_v30 = vsel %vm319_vm1, %v316_v25, 0.0 }
  0xb0   : > { %v243_v63 = vpop.permute.xlu0 %242  ;;  %v247_v0 = vpop.permute.xlu1 %246 }
  0xb1   : > { %v266_v1 = vsub.f32 %v853_v3, %v243_v63  ;;  %v268_v2 = vsub.f32 %v856_v5, %v247_v0 }
  0xb3   : > { %v311_v7 = vmul.f32 %v266_v1, %v266_v1  ;;  %v313_v11 = vmul.f32 %v268_v2, %v268_v2 }
  0xb5   : > { %v320_v3 = vsel %vm319_vm1, %v311_v7, 0.0  ;;  %v323_v21 = vsel %vm319_vm1, %v313_v11, 0.0 }
  0xb8   : > { %v245_v4 = vpop.permute.xlu0 %244  ;;  %v249_v9 = vpop.permute.xlu1 %248 }
  0xb9   : > { %v267_v8 = vsub.f32 %v868_v13, %v245_v4  ;;  %v269_v10 = vsub.f32 %v871_v14, %v249_v9 }
  0xbb   : > { %v312_v16 = vmul.f32 %v267_v8, %v267_v8  ;;  %v314_v19 = vmul.f32 %v269_v10, %v269_v10 }
  0xbd   : > { %v321_v5 = vsel %vm319_vm1, %v312_v16, 0.0  ;;  %v325_v13 = vsel %vm319_vm1, %v314_v19, 0.0 }
  0xbe   : > { %v322_v20 = vadd.f32 %v321_v5, %v320_v3 }
  0xc0   : > { %v324_v26 = vadd.f32 %v323_v21, %v322_v20  ;;  %v255_v14 = vpop.permute.xlu0 %254  ;;  %v257_v12 = vpop.permute.xlu1 %256 }
  0xc1   : > { %v272_v27 = vsub.f32 %v883_v22, %v255_v14  ;;  %v273_v17 = vsub.f32 %v886_v23, %v257_v12 }
  0xc2   : > { %v326_v28 = vadd.f32 %v325_v13, %v324_v26 }
  0xc3   : > { %v317_v31 = vmul.f32 %v272_v27, %v272_v27  ;;  %v318_v33 = vmul.f32 %v273_v17, %v273_v17 }
  0xc4   : > { %v328_v32 = vadd.f32 %v327_v29, %v326_v28 }
  0xc5   : > { %v331_v34 = vsel %vm319_vm1, %v317_v31, 0.0  ;;  %v333_v36 = vsel %vm319_vm1, %v318_v33, 0.0 }
  0xc6   : > { %v330_v35 = vadd.f32 %v329_v30, %v328_v32 }
  0xc8   : > { %v332_v37 = vadd.f32 %v331_v34, %v330_v35 }
  0xca   : > { %v334_v38 = vadd.f32 %v333_v36, %v332_v37 }
  0xcc   : > { %335 = vadd.xlane.f32.xlu0 %v334_v38 }
  0xe4   : > { %v303_v22 = vpop.xlane.xlu2 %302 }
  0xe5   : > { %v304_v39 = vrot.slane %v303_v22, 4 }
  0xe7   : > { %v305_v40 = vadd.f32 %v304_v39, %v303_v22 }
  0xe9   : > { %v306_v41 = vrot.slane %v305_v40, 2 }
  0xeb   : > { %v307_v23 = vadd.f32 %v306_v41, %v305_v40  ;;  %v356_v44 = vpop.xlane.xlu1 %355 }
  0xec   : > { %v357_v45 = vrot.slane %v356_v44, 4 }
  0xed   : > { %v308_v42 = vrot.slane %v307_v23, 1 }
  0xee   : > { %v358_v46 = vadd.f32 %v357_v45, %v356_v44 }
  0xef   : > { %v309_v43 = vadd.f32 %v308_v42, %v307_v23 }
  0xf0   : > { %v359_v47 = vrot.slane %v358_v46, 2 }
  0xf1   : > { %501 = vpush %v309_v43 }
  0xf2   : > { %v360_v51 = vadd.f32 %v359_v47, %v358_v46 }
  0xf4   : > { %v361_v54 = vrot.slane %v360_v51, 1 }
  0xf6   : > { %v362_v57 = vadd.f32 %v361_v54, %v360_v51 }
 0x122   : > { %s502_s8 = spop %501 }
 0x13f   : > { %v336_v48 = vpop.xlane.xlu0 %335 }
 0x140   : > { %v337_v49 = vrot.slane %v336_v48, 4 }
 0x142   : > { %v338_v50 = vadd.f32 %v337_v49, %v336_v48 }
 0x144   : > { %v339_v52 = vrot.slane %v338_v50, 2 }
 0x146   : > { %v340_v53 = vadd.f32 %v339_v52, %v338_v50 }
 0x148   : > { %v341_v55 = vrot.slane %v340_v53, 1 }
 0x14a   : > { %v342_v56 = vadd.f32 %v341_v55, %v340_v53 }
 0x14c   : > { %503 = vpush %v342_v56 }
 0x14d   : > { %505 = vpush %v362_v57 }
 0x17d   : > { %s504_s16 = spop %503 }
 0x17e   : > { %s506_s17 = spop %505 }
 0x17f   : > { %s364_s5 = sadd.f32 %s506_s17, %s504_s16 }
 0x181   : > { %s365_s6 = smul.f32 6.0, %s364_s5 }
 0x183   : > { %s366_s7 = sadd.f32 %s502_s8, %s365_s6 }
 0x185   : > { %v367_v58 = vstv %s366_s7 }
 0x186   : > { %368 = vst [vmem:[%s207_s30] sm:$0xff] %v367_v58 }
 0x187   : > { %648 = shalt.err (!%p645_p0)
}
 0x188   : > { %511 = dma.vmem_to_hbm [thread:$0]  (%p761_p11), %s383_s24, 128, %s385_s25, %s370_s14  }
 0x189 PF: > { %s396_s23 = sand.u32 1, %s679_s9   ;;  %p985_p1 = scmp.ge.s32.totalorder %s691_s12, 2 }
 0x18a   : > { %s397_s8 = scalar_lea.sflag [#allocation4], %s396_s23 }
 0x18b   : > { %p521_p4 = pnand %p985_p1, %p765_p12 }
 0x18d   : > { %p522_p7 = pneg %p521_p4 }
 0x18f   : > { %674 = dma.done.wait (%p522_p7), %s397_s8, 128  }
 0x190   : > { %676 = vsyncadd (%p522_p7), %s397_s8, 4294967168  ;;  %p18_p5 = scmp.ge.s32.totalorder %s736_s15, 4   ;;  %s986_s9 = smov %s683_s10 }
 0x191   : > { %s987_s10 = smov %s687_s11  ;;  %s988_s11 = smov %s748_s18 }
 0x192   : > { %s989_s12 = smov %s736_s15  ;;  %20 = sbr.rel (!%p18_p5) target bundleno = 7 (0x7), region = 86 }
 0x197   :  { %403 = vsyncpa [#allocation3], 1 }
 0x198   :  { %405 = vsyncpa [#allocation3 + $0x1], 1 }
 0x199   :  { %406 = vsyncpa [#allocation6], 1 }
 0x19a   :  { %408 = vsyncpa [#allocation6 + $0x1], 1 }
 0x19b   :  { %409 = vsyncpa [#allocation4], 1 }
 0x19c   :  { %411 = vsyncpa [#allocation4 + $0x1], 1 }

</bundles_post_ra>
